<compile_context>
chip_gen: v5e
topology: v5e:2x2
jax: 0.10.0
libtpu: 0.0.40
codegen_flags: <defaults>
</compile_context>

<pallas_src>
import functools

import jax
import jax.numpy as jnp
from jax.experimental import pallas as pl
from jax.experimental.pallas import tpu as pltpu

LANE = 128
SUBLANE = 8
BN_EPS = 1e-5


def _round_up(n, m):
    return ((n + m - 1) // m) * m


def _pad2d(a, rows, cols):
    r, c = a.shape
    return jnp.pad(a, ((0, rows - r), (0, cols - c)))


# ---------------------------------------------------------------------------
# Shared MLP tail (weights arrive pre-cast to the MXU dtype; f32 accumulate).
# ---------------------------------------------------------------------------
def _dense(h, w_ref, b_ref, mm_dtype):
    return jnp.dot(h.astype(mm_dtype), w_ref[...],
                   preferred_element_type=jnp.float32) + b_ref[...]


def _mlp(h, w1_ref, b1_ref, w2_ref, b2_ref, w3_ref, b3_ref, o_ref, mm_dtype):
    h = jnp.maximum(_dense(h, w1_ref, b1_ref, mm_dtype), 0.0)
    h = jnp.maximum(_dense(h, w2_ref, b2_ref, mm_dtype), 0.0)
    o_ref[...] = jnp.tanh(_dense(h, w3_ref, b3_ref, mm_dtype)).astype(o_ref.dtype)


# ---------------------------------------------------------------------------
# Single-launch fused kernel (whole batch resident): stats + BN + MLP.
# ---------------------------------------------------------------------------
def fused_actor_kernel(x_ref, w1_ref, b1_ref, w2_ref, b2_ref, w3_ref, b3_ref,
                       o_ref, *, inv_b, mm_dtype):
    x = x_ref[...].astype(jnp.float32)
    s = jnp.sum(x, axis=0, keepdims=True)
    ss = jnp.sum(x * x, axis=0, keepdims=True)
    mean = s * inv_b
    var = jnp.maximum(ss * inv_b - mean * mean, 0.0)   # biased (train-mode) var
    inv_std = jax.lax.rsqrt(var + BN_EPS)
    h = (x - mean) * inv_std
    _mlp(h, w1_ref, b1_ref, w2_ref, b2_ref, w3_ref, b3_ref, o_ref, mm_dtype)


# ---------------------------------------------------------------------------
# Pass 1 (large batch): exact full-batch BN statistics, finalized in-kernel.
# The (1, F) outputs double as resident accumulators (sum / sumsq); the bulk of
# the axis-0 reduction lowers to VALU vreg adds with one cross-sublane finish
# per tile.
# TODO(synk): a v7x-only variant could emit per-core partial sums under a
# leading "parallel" axis to use both TensorCores for this reduction.
# ---------------------------------------------------------------------------
def bn_stats_kernel(x_ref, mean_ref, inv_std_ref, *, inv_b):
    @pl.when(pl.program_id(0) == 0)
    def _():
        mean_ref[...] = jnp.zeros_like(mean_ref)
        inv_std_ref[...] = jnp.zeros_like(inv_std_ref)

    x = x_ref[...].astype(jnp.float32)
    mean_ref[...] += jnp.sum(x, axis=0, keepdims=True)          # running sum
    inv_std_ref[...] += jnp.sum(x * x, axis=0, keepdims=True)   # running sumsq

    @pl.when(pl.program_id(0) == pl.num_programs(0) - 1)
    def _():
        mean = mean_ref[...] * inv_b
        var = jnp.maximum(inv_std_ref[...] * inv_b - mean * mean, 0.0)
        mean_ref[...] = mean
        inv_std_ref[...] = jax.lax.rsqrt(var + BN_EPS)


# ---------------------------------------------------------------------------
# Pass 2 (large batch): row-parallel fused BN-normalize + MLP.
# ---------------------------------------------------------------------------
def actor_mlp_kernel(x_ref, mean_ref, inv_std_ref,
                     w1_ref, b1_ref, w2_ref, b2_ref, w3_ref, b3_ref,
                     o_ref, *, mm_dtype):
    h = (x_ref[...].astype(jnp.float32) - mean_ref[...]) * inv_std_ref[...]
    _mlp(h, w1_ref, b1_ref, w2_ref, b2_ref, w3_ref, b3_ref, o_ref, mm_dtype)


# ---------------------------------------------------------------------------
# Host wrapper.
# ---------------------------------------------------------------------------
def actor_forward(x, w1, b1, w2, b2, w3, b3, *,
                  block_b=2048, use_bf16_matmul=True):
    B, F = x.shape
    H1, H2, A = w1.shape[1], w2.shape[1], w3.shape[1]
    H1p, H2p, Ap = (_round_up(d, LANE) for d in (H1, H2, A))

    mm_dtype = jnp.bfloat16 if use_bf16_matmul else jnp.float32

    # Weights: keep feature dim F unpadded; pad hidden/action dims to full
    # 128-lane tiles; pre-cast once host-side so no per-step VPU casts.
    w1p = _pad2d(w1, F, H1p).astype(mm_dtype)
    w2p = _pad2d(w2, H1p, H2p).astype(mm_dtype)
    w3p = _pad2d(w3, H2p, Ap).astype(mm_dtype)
    b1p = _pad2d(jnp.reshape(b1, (1, -1)), 1, H1p).astype(jnp.float32)
    b2p = _pad2d(jnp.reshape(b2, (1, -1)), 1, H2p).astype(jnp.float32)
    b3p = _pad2d(jnp.reshape(b3, (1, -1)), 1, Ap).astype(jnp.float32)

    weight_specs = [
        pl.BlockSpec((F, H1p), lambda i: (0, 0)),     # W1 (resident)
        pl.BlockSpec((1, H1p), lambda i: (0, 0)),     # b1
        pl.BlockSpec((H1p, H2p), lambda i: (0, 0)),   # W2
        pl.BlockSpec((1, H2p), lambda i: (0, 0)),     # b2
        pl.BlockSpec((H2p, Ap), lambda i: (0, 0)),    # W3
        pl.BlockSpec((1, Ap), lambda i: (0, 0)),      # b3
    ]

    x32 = x if x.dtype == jnp.float32 else x.astype(jnp.float32)
    inv_b = 1.0 / B
    block_b = _round_up(max(block_b, SUBLANE), SUBLANE)
    B8 = _round_up(B, SUBLANE)

    if B8 <= block_b:
        # ---- single fused launch: stats + BN + MLP (launch-overhead regime) ----
        Bp = B8
        xp = x32 if Bp == B else jnp.pad(x32, ((0, Bp - B), (0, 0)))
        out = pl.pallas_call(
            functools.partial(fused_actor_kernel, inv_b=inv_b, mm_dtype=mm_dtype),
            out_shape=jax.ShapeDtypeStruct((Bp, Ap), jnp.float32),
            grid=(1,),
            in_specs=[pl.BlockSpec((Bp, F), lambda i: (0, 0))] + weight_specs,
            out_specs=pl.BlockSpec((Bp, Ap), lambda i: (0, 0)),
            compiler_params=pltpu.CompilerParams(
                dimension_semantics=("arbitrary",)),
        )(xp, w1p, b1p, w2p, b2p, w3p, b3p)
        return out[:B, :A]

    # ---- large batch: exact two-pass (stats reduction, then parallel BN+MLP) ----
    tb = block_b
    Bp = _round_up(B, tb)
    n_tiles = Bp // tb                      # >= 2 here (B8 > block_b)
    xp = x32 if Bp == B else jnp.pad(x32, ((0, Bp - B), (0, 0)))

    mean, inv_std = pl.pallas_call(
        functools.partial(bn_stats_kernel, inv_b=inv_b),
        out_shape=(jax.ShapeDtypeStruct((1, F), jnp.float32),
                   jax.ShapeDtypeStruct((1, F), jnp.float32)),
        grid=(n_tiles,),
        in_specs=[pl.BlockSpec((tb, F), lambda i: (i, 0))],
        out_specs=(pl.BlockSpec((1, F), lambda i: (0, 0)),
                   pl.BlockSpec((1, F), lambda i: (0, 0))),
        compiler_params=pltpu.CompilerParams(
            dimension_semantics=("arbitrary",)),
    )(xp)

    out = pl.pallas_call(
        functools.partial(actor_mlp_kernel, mm_dtype=mm_dtype),
        out_shape=jax.ShapeDtypeStruct((Bp, Ap), jnp.float32),
        grid=(n_tiles,),
        in_specs=[pl.BlockSpec((tb, F), lambda i: (i, 0)),   # x tile (pipelined)
                  pl.BlockSpec((1, F), lambda i: (0, 0)),    # mean   (resident)
                  pl.BlockSpec((1, F), lambda i: (0, 0))]    # inv_std(resident)
                 + weight_specs,
        out_specs=pl.BlockSpec((tb, Ap), lambda i: (i, 0)),
        compiler_params=pltpu.CompilerParams(
            dimension_semantics=("parallel",)),
    )(xp, mean, inv_std, w1p, b1p, w2p, b2p, w3p, b3p)
    return out[:B, :A]


# ---------------------------------------------------------------------------
# Deterministic init mimicking PyTorch defaults + uniform(-0.003, 0.003) on W3.
# ---------------------------------------------------------------------------
def init_params(key, feature_numbers, h1, h2, action_numbers):
    ks = jax.random.split(key, 6)

    def lin(kw, kb, fan_in, fan_out):
        bound = 1.0 / jnp.sqrt(fan_in)
        w = jax.random.uniform(kw, (fan_in, fan_out), jnp.float32, -bound, bound)
        b = jax.random.uniform(kb, (1, fan_out), jnp.float32, -bound, bound)
        return w, b

    w1, b1 = lin(ks[0], ks[1], feature_numbers, h1)
    w2, b2 = lin(ks[2], ks[3], h1, h2)
    w3 = jax.random.uniform(ks[4], (h2, action_numbers), jnp.float32, -0.003, 0.003)
    b_bound = 1.0 / jnp.sqrt(h2)
    b3 = jax.random.uniform(ks[5], (1, action_numbers), jnp.float32, -b_bound, b_bound)
    return w1, b1, w2, b2, w3, b3


def reference_forward(x, w1, b1, w2, b2, w3, b3):
    mean = jnp.mean(x, axis=0, keepdims=True)
    var = jnp.mean((x - mean) ** 2, axis=0, keepdims=True)
    h = (x - mean) * jax.lax.rsqrt(var + BN_EPS)
    h = jnp.maximum(h @ w1 + b1, 0.0)
    h = jnp.maximum(h @ w2 + b2, 0.0)
    return jnp.tanh(h @ w3 + b3)


if __name__ == "__main__":
    feature_numbers = 16
    neural_nums_a_1 = 32   # config['neuron_nums_a_1']
    neural_nums_a_2 = 32   # config['neuron_nums_a_2']
    action_numbers = 4

    key = jax.random.PRNGKey(0)
    kx1, kx2, kp = jax.random.split(key, 3)
    params = init_params(kp, feature_numbers, neural_nums_a_1,
                         neural_nums_a_2, action_numbers)

    # --- small batch: single fused launch path ---
    x_small = jax.random.normal(kx1, (8, feature_numbers), dtype=jnp.float32)
    ref_small = reference_forward(x_small, *params)

    out_f32 = jax.block_until_ready(
        actor_forward(x_small, *params, use_bf16_matmul=False))
    assert out_f32.shape == (8, action_numbers)
    assert bool(jnp.allclose(out_f32, ref_small, rtol=1e-4, atol=1e-4))

    out_bf16 = jax.block_until_ready(actor_forward(x_small, *params))  # bf16 MXU default
    assert out_bf16.shape == (8, action_numbers)
    assert bool(jnp.all(jnp.abs(out_bf16) <= 1.0))
    assert bool(jnp.allclose(out_bf16, ref_small, rtol=2e-2, atol=2e-2))

    # --- larger batch with small block_b to exercise the tiled two-pass path ---
    x_big = jax.random.normal(kx2, (1000, feature_numbers), dtype=jnp.float32)
    ref_big = reference_forward(x_big, *params)

    out_big_f32 = jax.block_until_ready(
        actor_forward(x_big, *params, block_b=256, use_bf16_matmul=False))
    assert out_big_f32.shape == (1000, action_numbers)
    assert bool(jnp.allclose(out_big_f32, ref_big, rtol=1e-3, atol=5e-4))

    out_big_bf16 = jax.block_until_ready(
        actor_forward(x_big, *params, block_b=256))
    assert out_big_bf16.shape == (1000, action_numbers)
    assert bool(jnp.allclose(out_big_bf16, ref_big, rtol=2e-2, atol=2e-2))

    print("KERNEL_OK")
</pallas_src>

<mosaic_0001>
module attributes {stable_mosaic.version = 11 : i64} {
  func.func @fused_actor_kernel(%arg0: i32, %arg1: memref<8x16xf32, #tpu.memory_space<vmem>>, %arg2: memref<16x128xf32, #tpu.memory_space<vmem>>, %arg3: memref<1x128xf32, #tpu.memory_space<vmem>>, %arg4: memref<128x128xf32, #tpu.memory_space<vmem>>, %arg5: memref<1x128xf32, #tpu.memory_space<vmem>>, %arg6: memref<128x128xf32, #tpu.memory_space<vmem>>, %arg7: memref<1x128xf32, #tpu.memory_space<vmem>>, %arg8: memref<8x128xf32, #tpu.memory_space<vmem>>) attributes {dimension_semantics = [#tpu.dimension_semantics<arbitrary>], iteration_bounds = array<i64: 1>, scalar_prefetch = 0 : i64, scratch_operands = 0 : i64, tpu.core_type = #tpu.core_type<tc>, window_params = [{pipeline_mode = #tpu.pipeline_mode<synchronous>, transform_indices = @transform_0, window_bounds = array<i64: 8, 16>}, {pipeline_mode = #tpu.pipeline_mode<synchronous>, transform_indices = @transform_1, window_bounds = array<i64: 16, 128>}, {pipeline_mode = #tpu.pipeline_mode<synchronous>, transform_indices = @transform_2, window_bounds = array<i64: 1, 128>}, {pipeline_mode = #tpu.pipeline_mode<synchronous>, transform_indices = @transform_3, window_bounds = array<i64: 128, 128>}, {pipeline_mode = #tpu.pipeline_mode<synchronous>, transform_indices = @transform_4, window_bounds = array<i64: 1, 128>}, {pipeline_mode = #tpu.pipeline_mode<synchronous>, transform_indices = @transform_5, window_bounds = array<i64: 128, 128>}, {pipeline_mode = #tpu.pipeline_mode<synchronous>, transform_indices = @transform_6, window_bounds = array<i64: 1, 128>}, {pipeline_mode = #tpu.pipeline_mode<synchronous>, transform_indices = @transform_7, window_bounds = array<i64: 8, 128>}]} {
    %c0 = arith.constant 0 : index
    %c0_0 = arith.constant 0 : index
    %0 = vector.load %arg1[%c0, %c0_0] : memref<8x16xf32, #tpu.memory_space<vmem>>, vector<8x16xf32>
    %cst = arith.constant dense<0.000000e+00> : vector<16xf32>
    %1 = vector.multi_reduction <add>, %0, %cst [0] : vector<8x16xf32> to vector<16xf32>
    %2 = vector.shape_cast %1 : vector<16xf32> to vector<1x16xf32>
    %3 = arith.mulf %0, %0 : vector<8x16xf32>
    %cst_1 = arith.constant dense<0.000000e+00> : vector<16xf32>
    %4 = vector.multi_reduction <add>, %3, %cst_1 [0] : vector<8x16xf32> to vector<16xf32>
    %5 = vector.shape_cast %4 : vector<16xf32> to vector<1x16xf32>
    %cst_2 = arith.constant 1.250000e-01 : f32
    %6 = vector.broadcast %cst_2 : f32 to vector<1x16xf32>
    %7 = arith.mulf %2, %6 : vector<1x16xf32>
    %cst_3 = arith.constant 1.250000e-01 : f32
    %8 = vector.broadcast %cst_3 : f32 to vector<1x16xf32>
    %9 = arith.mulf %5, %8 : vector<1x16xf32>
    %10 = arith.mulf %7, %7 : vector<1x16xf32>
    %11 = arith.subf %9, %10 : vector<1x16xf32>
    %cst_4 = arith.constant 0.000000e+00 : f32
    %12 = vector.broadcast %cst_4 : f32 to vector<1x16xf32>
    %13 = arith.maximumf %11, %12 : vector<1x16xf32>
    %cst_5 = arith.constant 9.99999974E-6 : f32
    %14 = vector.broadcast %cst_5 : f32 to vector<1x16xf32>
    %15 = arith.addf %13, %14 : vector<1x16xf32>
    %16 = math.rsqrt %15 : vector<1x16xf32>
    %17 = vector.broadcast %7 : vector<1x16xf32> to vector<8x16xf32>
    %18 = arith.subf %0, %17 : vector<8x16xf32>
    %19 = vector.broadcast %16 : vector<1x16xf32> to vector<8x16xf32>
    %20 = arith.mulf %18, %19 : vector<8x16xf32>
    %c0_6 = arith.constant 0 : index
    %c0_7 = arith.constant 0 : index
    %21 = vector.load %arg2[%c0_6, %c0_7] : memref<16x128xf32, #tpu.memory_space<vmem>>, vector<16x128xf32>
    %cst_8 = arith.constant dense<0.000000e+00> : vector<8x128xf32>
    %22 = tpu.matmul %20, %21, %cst_8 {dimension_numbers = #tpu.dot_dimension_numbers<[1], [0], [0], [1], [0, 0, 1, 1], [], []>} : vector<8x16xf32>, vector<16x128xf32>, vector<8x128xf32> -> vector<8x128xf32>
    %c0_9 = arith.constant 0 : index
    %c0_10 = arith.constant 0 : index
    %23 = vector.load %arg3[%c0_9, %c0_10] : memref<1x128xf32, #tpu.memory_space<vmem>>, vector<1x128xf32>
    %24 = vector.broadcast %23 : vector<1x128xf32> to vector<8x128xf32>
    %25 = arith.addf %22, %24 : vector<8x128xf32>
    %cst_11 = arith.constant 0.000000e+00 : f32
    %26 = vector.broadcast %cst_11 : f32 to vector<8x128xf32>
    %27 = arith.maximumf %25, %26 : vector<8x128xf32>
    %c0_12 = arith.constant 0 : index
    %c0_13 = arith.constant 0 : index
    %28 = vector.load %arg4[%c0_12, %c0_13] : memref<128x128xf32, #tpu.memory_space<vmem>>, vector<128x128xf32>
    %cst_14 = arith.constant dense<0.000000e+00> : vector<8x128xf32>
    %29 = tpu.matmul %27, %28, %cst_14 {dimension_numbers = #tpu.dot_dimension_numbers<[1], [0], [0], [1], [0, 0, 1, 1], [], []>} : vector<8x128xf32>, vector<128x128xf32>, vector<8x128xf32> -> vector<8x128xf32>
    %c0_15 = arith.constant 0 : index
    %c0_16 = arith.constant 0 : index
    %30 = vector.load %arg5[%c0_15, %c0_16] : memref<1x128xf32, #tpu.memory_space<vmem>>, vector<1x128xf32>
    %31 = vector.broadcast %30 : vector<1x128xf32> to vector<8x128xf32>
    %32 = arith.addf %29, %31 : vector<8x128xf32>
    %cst_17 = arith.constant 0.000000e+00 : f32
    %33 = vector.broadcast %cst_17 : f32 to vector<8x128xf32>
    %34 = arith.maximumf %32, %33 : vector<8x128xf32>
    %c0_18 = arith.constant 0 : index
    %c0_19 = arith.constant 0 : index
    %35 = vector.load %arg6[%c0_18, %c0_19] : memref<128x128xf32, #tpu.memory_space<vmem>>, vector<128x128xf32>
    %cst_20 = arith.constant dense<0.000000e+00> : vector<8x128xf32>
    %36 = tpu.matmul %34, %35, %cst_20 {dimension_numbers = #tpu.dot_dimension_numbers<[1], [0], [0], [1], [0, 0, 1, 1], [], []>} : vector<8x128xf32>, vector<128x128xf32>, vector<8x128xf32> -> vector<8x128xf32>
    %c0_21 = arith.constant 0 : index
    %c0_22 = arith.constant 0 : index
    %37 = vector.load %arg7[%c0_21, %c0_22] : memref<1x128xf32, #tpu.memory_space<vmem>>, vector<1x128xf32>
    %38 = vector.broadcast %37 : vector<1x128xf32> to vector<8x128xf32>
    %39 = arith.addf %36, %38 : vector<8x128xf32>
    %40 = math.tanh %39 : vector<8x128xf32>
    %c0_23 = arith.constant 0 : index
    %c0_24 = arith.constant 0 : index
    %41 = vector.load %arg8[%c0_23, %c0_24] : memref<8x128xf32, #tpu.memory_space<vmem>>, vector<8x128xf32>
    tpu.vector_store %arg8[%c0_23, %c0_24], %40 {strides = array<i32>} : memref<8x128xf32, #tpu.memory_space<vmem>>, vector<8x128xf32>,
    return
  }
  func.func @transform_0(%arg0: i32) -> (i32, i32) {
    %c0_i32 = arith.constant 0 : i32
    %c0_i32_0 = arith.constant 0 : i32
    %c0_i32_1 = arith.constant 0 : i32
    return %c0_i32, %c0_i32_0 : i32, i32
  }
  func.func @transform_1(%arg0: i32) -> (i32, i32) {
    %c0_i32 = arith.constant 0 : i32
    %c0_i32_0 = arith.constant 0 : i32
    %c0_i32_1 = arith.constant 0 : i32
    return %c0_i32, %c0_i32_0 : i32, i32
  }
  func.func @transform_2(%arg0: i32) -> (i32, i32) {
    %c0_i32 = arith.constant 0 : i32
    %c0_i32_0 = arith.constant 0 : i32
    %c0_i32_1 = arith.constant 0 : i32
    return %c0_i32, %c0_i32_0 : i32, i32
  }
  func.func @transform_3(%arg0: i32) -> (i32, i32) {
    %c0_i32 = arith.constant 0 : i32
    %c0_i32_0 = arith.constant 0 : i32
    %c0_i32_1 = arith.constant 0 : i32
    return %c0_i32, %c0_i32_0 : i32, i32
  }
  func.func @transform_4(%arg0: i32) -> (i32, i32) {
    %c0_i32 = arith.constant 0 : i32
    %c0_i32_0 = arith.constant 0 : i32
    %c0_i32_1 = arith.constant 0 : i32
    return %c0_i32, %c0_i32_0 : i32, i32
  }
  func.func @transform_5(%arg0: i32) -> (i32, i32) {
    %c0_i32 = arith.constant 0 : i32
    %c0_i32_0 = arith.constant 0 : i32
    %c0_i32_1 = arith.constant 0 : i32
    return %c0_i32, %c0_i32_0 : i32, i32
  }
  func.func @transform_6(%arg0: i32) -> (i32, i32) {
    %c0_i32 = arith.constant 0 : i32
    %c0_i32_0 = arith.constant 0 : i32
    %c0_i32_1 = arith.constant 0 : i32
    return %c0_i32, %c0_i32_0 : i32, i32
  }
  func.func @transform_7(%arg0: i32) -> (i32, i32) {
    %c0_i32 = arith.constant 0 : i32
    %c0_i32_0 = arith.constant 0 : i32
    %c0_i32_1 = arith.constant 0 : i32
    return %c0_i32, %c0_i32_0 : i32, i32
  }
}

</mosaic_0001>

<bundles_post_ra>
// kernel: tpu_custom_call.1
= control target key start
LH: loop header
LB: loop body
LE: loop exit
PB: predicated region body
PF: predicated region fallthrough
CT: control target
= control target key end

     0   :  { %12 = vsyncpa [#allocation3], 0  ;;  %s478_s0 = inlined_call_operand.hbm [shape: f32[8,16], index: 0, kind: input, shape index: {}]   ;;  %s479_s1 = inlined_call_operand.hbm [shape: f32[16,128], index: 1, kind: input, shape index: {}]   ;;  %s480_s2 = inlined_call_operand.vmem [shape: f32[1,128], index: 2, kind: input, shape index: {}]   ;;  %s481_s3 = inlined_call_operand.hbm [shape: f32[128,128], index: 3, kind: input, shape index: {}]   ;;  %s482_s4 = inlined_call_operand.vmem [shape: f32[1,128], index: 4, kind: input, shape index: {}]   ;;  %s483_s5 = inlined_call_operand.hbm [shape: f32[128,128], index: 5, kind: input, shape index: {}]   ;;  %s484_s6 = inlined_call_operand.vmem [shape: f32[1,128], index: 6, kind: input, shape index: {}]   ;;  %s485_s7 = inlined_call_operand.hbm [shape: f32[8,128], index: 7, kind: output, shape index: {}]  }
   0x1   :  { %13 = vsyncpa [#allocation6], 0 }
   0x2   :  { %14 = vsyncpa [#allocation9], 0  ;;  %s31_s26 = sshll.u32 %s479_s1, 4  ;;  %s32_s26 = int_to_ptr.hbm [resolvable:$true] %s31_s26 }
   0x3   :  { %15 = vsyncpa [#allocation4], 0  ;;  %s398_s27 = smov [#allocation5]   ;;  %s21_s8 = sshll.u32 %s478_s0, 4  ;;  %s22_s8 = int_to_ptr.hbm [resolvable:$true] %s21_s8 }
   0x4   :  { %s33_s28 = sshll.u32 %s398_s27, 4  ;;  %s399_s9 = smov 128   ;;  %s34_s28 = int_to_ptr.vmem [resolvable:$true] %s33_s28 }
   0x5   :  { %s400_s10 = smov 8   ;;  %s401_s11 = smov [#allocation2]  }
   0x6   :  { %39 = dma.hbm_to_vmem [thread:$0]  %s32_s26, 256, %s34_s28, [#allocation6], %s399_s9, %s399_s9, %s400_s10  }
   0x7   :  { %s23_s12 = sshll.u32 %s401_s11, 4  ;;  %s46_s15 = sshll.u32 %s481_s3, 4  ;;  %s24_s12 = int_to_ptr.vmem [resolvable:$true] %s23_s12  ;;  %s47_s15 = int_to_ptr.hbm [resolvable:$true] %s46_s15 }
   0x8   :  { %26 = dma.hbm_to_vmem [thread:$0]  %s22_s8, 128, %s24_s12, [#allocation3]  }
   0x9   :  { %s61_s17 = sshll.u32 %s483_s5, 4  ;;  %s402_s18 = smov [#allocation7]   ;;  %s62_s17 = int_to_ptr.hbm [resolvable:$true] %s61_s17 }
   0xa   :  { %s48_s19 = sshll.u32 %s402_s18, 4  ;;  %s403_s0 = smov [#allocation8]   ;;  %s49_s19 = int_to_ptr.vmem [resolvable:$true] %s48_s19 }
   0xb   :  { %54 = dma.hbm_to_vmem [thread:$0]  %s47_s15, 2048, %s49_s19, [#allocation6], %s399_s9, %s399_s9, %s400_s10  }
   0xc   :  { %s63_s20 = sshll.u32 %s403_s0, 4  ;;  %s64_s20 = int_to_ptr.vmem [resolvable:$true] %s63_s20 }
   0xd   :  { %69 = dma.hbm_to_vmem [thread:$0]  %s62_s17, 2048, %s64_s20, [#allocation9], %s399_s9, %s399_s9, %s400_s10  }
   0xe   :  { %390 = dma.done.wait [#allocation3], 128  }
   0xf   :  { %391 = vsyncadd [#allocation3], 4294967168 }
  0x10   :  { %392 = dma.done.wait [#allocation6], 2304  }
  0x11   :  { %393 = vsyncadd [#allocation6], 4294964992 }
  0x12   :  { %394 = dma.done.wait [#allocation9], 2048  }
  0x13   :  { %395 = vsyncadd [#allocation9], 4294965248  ;;  %vm89_vm0 = vcmask 130048   ;;  %v124_v0 = vld [vmem:[#allocation5 + $0x8] sm:$0xff]  ;;  %v123_v1 = vld [vmem:[#allocation5] sm:$0xff]  ;;  %s404_s24 = smov [#allocation10]  }
  0x14   :  { %v457_v2 = vld [vmem:[#allocation2] sm:$0xff]  ;;  %146 = vmatpush.msra.mxu0 %v124_v0  ;;  %v168_v17 = vld [vmem:[#allocation7 + $0x78] sm:$0xff]  ;;  %v167_v18 = vld [vmem:[#allocation7 + $0x70] sm:$0xff]  ;;  %s241_s25 = sshll.u32 %s404_s24, 4  ;;  %s243_s28 = sshll.u32 %s485_s7, 4  ;;  %s242_s25 = int_to_ptr.vmem [resolvable:$true] %s241_s25  ;;  %s244_s28 = int_to_ptr.hbm [resolvable:$true] %s243_s28 }
  0x15   :  { %v90_v3 = vsel %vm89_vm0, %v457_v2, 0.0  ;;  %v97_v4 = vmul.f32 %v457_v2, %v457_v2  ;;  %173 = vmatpush.msra.mxu1 %v168_v17  ;;  %v166_v21 = vld [vmem:[#allocation7 + $0x68] sm:$0xff]  ;;  %v165_v24 = vld [vmem:[#allocation7 + $0x60] sm:$0xff]  ;;  %v164_v26 = vld [vmem:[#allocation7 + $0x58] sm:$0xff] }
  0x16   :  { %v91_v5 = vrot.slane %v90_v3, 4  ;;  %147 = vmatpush.msra.mxu0 %v123_v1  ;;  %v163_v28 = vld [vmem:[#allocation7 + $0x50] sm:$0xff]  ;;  %v162_v30 = vld [vmem:[#allocation7 + $0x48] sm:$0xff]  ;;  %v161_v31 = vld [vmem:[#allocation7 + $0x40] sm:$0xff] }
  0x17   :  { %v98_v6 = vsel %vm89_vm0, %v97_v4, 0.0  ;;  %174 = vmatpush.msra.mxu1 %v167_v18  ;;  %v160_v32 = vld [vmem:[#allocation7 + $0x38] sm:$0xff]  ;;  %v159_v33 = vld [vmem:[#allocation7 + $0x30] sm:$0xff]  ;;  %v158_v35 = vld [vmem:[#allocation7 + $0x28] sm:$0xff] }
  0x18   :  { %v92_v7 = vadd.f32 %v91_v5, %v90_v3  ;;  %v99_v8 = vrot.slane %v98_v6, 4  ;;  %v157_v37 = vld [vmem:[#allocation7 + $0x20] sm:$0xff]  ;;  %v156_v39 = vld [vmem:[#allocation7 + $0x18] sm:$0xff]  ;;  %v155_v46 = vld [vmem:[#allocation7 + $0x10] sm:$0xff] }
  0x19   :  { %175 = vmatpush.msra.mxu1 %v166_v21  ;;  %v154_v47 = vld [vmem:[#allocation7 + $0x8] sm:$0xff]  ;;  %v153_v48 = vld [vmem:[#allocation7] sm:$0xff]  ;;  %v209_v49 = vld [vmem:[#allocation8 + $0x78] sm:$0xff] }
  0x1a   :  { %v93_v9 = vrot.slane %v92_v7, 2  ;;  %v100_v10 = vadd.f32 %v99_v8, %v98_v6  ;;  %v208_v50 = vld [vmem:[#allocation8 + $0x70] sm:$0xff]  ;;  %214 = vmatpush.msra.mxu2 %v209_v49  ;;  %v207_v51 = vld [vmem:[#allocation8 + $0x68] sm:$0xff]  ;;  %v206_v52 = vld [vmem:[#allocation8 + $0x60] sm:$0xff] }
  0x1b   :  { %176 = vmatpush.msra.mxu1 %v165_v24  ;;  %v205_v53 = vld [vmem:[#allocation8 + $0x58] sm:$0xff]  ;;  %v204_v54 = vld [vmem:[#allocation8 + $0x50] sm:$0xff]  ;;  %v203_v55 = vld [vmem:[#allocation8 + $0x48] sm:$0xff] }
  0x1c   :  { %v94_v11 = vadd.f32 %v93_v9, %v92_v7  ;;  %v101_v12 = vrot.slane %v100_v10, 2  ;;  %215 = vmatpush.msra.mxu2 %v208_v50  ;;  %v202_v56 = vld [vmem:[#allocation8 + $0x40] sm:$0xff]  ;;  %v201_v57 = vld [vmem:[#allocation8 + $0x38] sm:$0xff]  ;;  %v200_v58 = vld [vmem:[#allocation8 + $0x30] sm:$0xff] }
  0x1d   :  { %177 = vmatpush.msra.mxu1 %v164_v26  ;;  %v199_v59 = vld [vmem:[#allocation8 + $0x28] sm:$0xff]  ;;  %v198_v60 = vld [vmem:[#allocation8 + $0x20] sm:$0xff]  ;;  %v197_v61 = vld [vmem:[#allocation8 + $0x18] sm:$0xff] }
  0x1e   :  { %v95_v13 = vrot.slane %v94_v11, 1  ;;  %v102_v14 = vadd.f32 %v101_v12, %v100_v10  ;;  %216 = vmatpush.msra.mxu2 %v207_v51  ;;  %v263_v62 = vld [vmem:[%s480_s2] ss:$0 sm:$0xff]  ;;  %v194_v4 = vld [vmem:[#allocation8] sm:$0xff] }
  0x1f   :  { %178 = vmatpush.msra.mxu1 %v163_v28  ;;  %v195_v3 = vld [vmem:[#allocation8 + $0x8] sm:$0xff] }
  0x20   :  { %v96_v15 = vadd.f32 %v95_v13, %v94_v11  ;;  %v103_v16 = vrot.slane %v102_v14, 1  ;;  %217 = vmatpush.msra.mxu2 %v206_v52  ;;  %v264_v5 = vld [vmem:[%s482_s4] ss:$0 sm:$0xff] }
  0x21   :  { %179 = vmatpush.msra.mxu1 %v162_v30  ;;  %v265_v9 = vld [vmem:[%s484_s6] ss:$0 sm:$0xff] }
  0x22   :  { %v104_v19 = vadd.f32 %v103_v16, %v102_v14  ;;  %v105_v20 = vmul.f32 0.125, %v96_v15  ;;  %218 = vmatpush.msra.mxu2 %v205_v53 }
  0x23   :  { %180 = vmatpush.msra.mxu1 %v161_v31 }
  0x24   :  { %v106_v22 = vmul.f32 0.125, %v104_v19  ;;  %v107_v23 = vmul.f32 %v105_v20, %v105_v20  ;;  %v121_v42 = vsub.f32 %v457_v2, %v105_v20  ;;  %219 = vmatpush.msra.mxu2 %v204_v54  ;;  %v196_v2 = vld [vmem:[#allocation8 + $0x10] sm:$0xff] }
  0x25   :  { %181 = vmatpush.msra.mxu1 %v160_v32 }
  0x26   :  { %v108_v25 = vsub.f32 %v106_v22, %v107_v23  ;;  %220 = vmatpush.msra.mxu2 %v203_v55 }
  0x27   :  { %182 = vmatpush.msra.mxu1 %v159_v33 }
  0x28   :  { %v109_v27 = vmax.f32 %v108_v25, 0.0  ;;  %221 = vmatpush.msra.mxu2 %v202_v56 }
  0x29   :  { %183 = vmatpush.msra.mxu1 %v158_v35 }
  0x2a   :  { %v110_v29 = vadd.f32 1e-05, %v109_v27  ;;  %222 = vmatpush.msra.mxu2 %v201_v57 }
  0x2b   :  { %184 = vmatpush.msra.mxu1 %v157_v37 }
  0x2c   :  { %266 = vrsqrt.f32 %v110_v29  ;;  %vm117_vm1 = vweird.f32 %v110_v29  ;;  %223 = vmatpush.msra.mxu2 %v200_v58 }
  0x2d   :  { %185 = vmatpush.msra.mxu1 %v156_v39 }
  0x2e   :  { %224 = vmatpush.msra.mxu2 %v199_v59 }
  0x2f   :  { %186 = vmatpush.msra.mxu1 %v155_v46 }
  0x30   :  { %225 = vmatpush.msra.mxu2 %v198_v60 }
  0x31   :  { %187 = vmatpush.msra.mxu1 %v154_v47 }
  0x32   :  { %v267_v34 = vpop.eup %266  ;;  %226 = vmatpush.msra.mxu2 %v197_v61 }
  0x33   :  { %v112_v36 = vmul.f32 %v267_v34, %v110_v29  ;;  %vm118_vm2 = vweird.f32 %v267_v34  ;;  %188 = vmatpush.msra.mxu1 %v153_v48 }
  0x34   :  { %vm119_vm3 = vmor %vm117_vm1, %vm118_vm2  ;;  %227 = vmatpush.msra.mxu2 %v196_v2 }
  0x35   :  { %v113_v38 = vmul.f32 %v267_v34, %v112_v36 }
  0x36   :  { %228 = vmatpush.msra.mxu2 %v195_v3 }
  0x37   :  { %v114_v40 = vmul.f32 0.5, %v113_v38 }
  0x38   :  { %229 = vmatpush.msra.mxu2 %v194_v4 }
  0x39   :  { %v115_v41 = vsub.f32 1.5, %v114_v40 }
  0x3b   :  { %v116_v43 = vmul.f32 %v267_v34, %v115_v41 }
  0x3d   :  { %v120_v44 = vsel %vm119_vm3, %v267_v34, %v116_v43 }
  0x3e   :  { %v122_v45 = vmul.f32 %v121_v42, %v120_v44 }
  0x40   :  { %255 = vmatmul.msk.f32.vlgmr.msra.gmra.mxu0 %vm89_vm0, %v122_v45 }
  0xbd   :  { %v149_v63 = vpop.f32.mrf.mxu0 }
  0xbe   :  { %v150_v0 = vadd.f32 %v263_v62, %v149_v63 }
  0xc0   :  { %v152_v1 = vmax.f32 %v150_v0, 0.0 }
  0xc2   :  { %189 = vmatmul.f32.vlgmr.msra.gmra.mxu1 %v152_v1 }
 0x13f   :  { %v190_v6 = vpop.f32.mrf.mxu1 }
 0x140   :  { %v191_v7 = vadd.f32 %v264_v5, %v190_v6 }
 0x142   :  { %v193_v8 = vmax.f32 %v191_v7, 0.0 }
 0x144   :  { %230 = vmatmul.f32.vlgmr.msra.gmra.mxu2 %v193_v8 }
 0x1c7   :  { %v231_v10 = vpop.f32.mrf.mxu2 }
 0x1c8   :  { %v232_v11 = vadd.f32 %v265_v9, %v231_v10 }
 0x1ca   :  { %268 = vtanh.f32 %v232_v11 }
 0x1d0   :  { %v269_v12 = vpop.eup %268 }
 0x1d1   :  { %235 = vst [vmem:[#allocation10] sm:$0xff] %v269_v12 }
 0x1d2   :  { %246 = dma.vmem_to_hbm [thread:$0]  %s242_s25, 128, %s244_s28, [#allocation4]  }
 0x1d3   :  { %396 = dma.done.wait [#allocation4], 128  }
 0x1d4   :  { %397 = vsyncadd [#allocation4], 4294967168 }
 0x1d5   :  { %251 = vsyncpa [#allocation3], 1 }
 0x1d6   :  { %252 = vsyncpa [#allocation6], 1 }
 0x1d7   :  { %253 = vsyncpa [#allocation9], 1 }
 0x1d8   :  { %254 = vsyncpa [#allocation4], 1 }

</bundles_post_ra>
